<compile_context>
chip_gen: v7x
topology: tpu7x:2x2x1
jax: 0.10.0
libtpu: 0.0.40
codegen_flags: <defaults>
</compile_context>

<pallas_src>
import functools

import jax
import jax.numpy as jnp
from jax.experimental import pallas as pl
from jax.experimental.pallas import tpu as pltpu


# ----------------------------------------------------------------------------
# Kernel 1: per-layer projection  xt = x @ W   and  all-head attention logits
#           alphas = xt @ A  where A is the block-diagonal concat of att_src/att_dst.
# Runs once per layer over a row-tile grid.
# ----------------------------------------------------------------------------
def _gat_project_kernel(x_ref, w_ref, a_ref, xt_ref, alphas_ref):
    x = x_ref[...].astype(jnp.bfloat16)                      # [T, F_in]
    w = w_ref[...]                                           # [F_in, H*F_out] bf16
    xt = jnp.dot(x, w, preferred_element_type=jnp.float32)   # [T, H*F_out] f32
    # alphas[:, h] = alpha_src for head h ; alphas[:, H+h] = alpha_dst for head h
    alphas_ref[...] = jnp.dot(xt, a_ref[...], preferred_element_type=jnp.float32)
    xt_ref[...] = xt.astype(xt_ref.dtype)                    # bf16 copy kept for the attn matmul


# ----------------------------------------------------------------------------
# Kernel 2: masked attention softmax + aggregation for one dst-node tile.
# ----------------------------------------------------------------------------
def _gat_attn_kernel(adst_ref, asrcT_ref, xt_ref, mask_ref, bias_ref, out_ref,
                     *, n_heads, f_out, negative_slope):
    # mask bias computed once per tile, shared across heads (int8 mask -> f32 additive bias)
    mask_bias = jnp.where(mask_ref[...] != 0, jnp.float32(0.0), jnp.float32(-1e30))  # [T, N]
    a_dst = adst_ref[...]                                    # [T, H] f32
    a_srcT = asrcT_ref[...]                                  # [H, N] f32

    outs = []
    for h in range(n_heads):                                 # static head loop (H is small)
        # scores[i, j] = alpha_dst[i] + alpha_src[j]
        s = a_dst[:, h:h + 1] + a_srcT[h:h + 1, :]           # [T, N]
        s = jnp.where(s > 0, s, negative_slope * s)          # LeakyReLU(0.2)
        s = s + mask_bias                                    # masked-out -> ~-1e30
        m = jnp.max(s, axis=-1, keepdims=True)
        p = jnp.exp(s - m)                                   # masked entries underflow to 0
        denom = jnp.sum(p, axis=-1, keepdims=True)
        # guard isolated rows (no in-edges / padded tile rows); EUP reciprocal is ~free
        inv = pl.reciprocal(jnp.maximum(denom, jnp.float32(1e-20)), approx=True)  # [T, 1]

        xh = xt_ref[:, h * f_out:(h + 1) * f_out]            # [N, F_out] bf16
        oh = jnp.dot(p.astype(jnp.bfloat16), xh,
                     preferred_element_type=jnp.float32)     # [T, F_out] f32
        outs.append(oh * inv)                                # normalize the small output, not p

    out = jnp.concatenate(outs, axis=-1) + bias_ref[...]     # [T, H*F_out], lane-dense
    # module activation ('relu') applied after every GATConv layer
    out_ref[...] = jnp.maximum(out, 0.0).astype(out_ref.dtype)


def _row_tile(n, cap=256):
    # cap=256 keeps (mask tile + scores temps + xt) comfortably inside v7x's 64 MiB VMEM
    # while still giving full pipelining on v5e/v6e.
    return n if n <= cap else cap


def gat_layer(x, w_bf16, attn_mat, bias, mask, *, n_heads, f_out, negative_slope=0.2):
    n, f_in = x.shape
    hf = n_heads * f_out
    t = _row_tile(n)
    grid = (pl.cdiv(n, t),)
    cparams = pltpu.CompilerParams(dimension_semantics=("parallel",))

    # --- projection + attention logits (once per layer) ---
    xt, alphas = pl.pallas_call(
        _gat_project_kernel,
        out_shape=(jax.ShapeDtypeStruct((n, hf), jnp.bfloat16),
                   jax.ShapeDtypeStruct((n, 2 * n_heads), jnp.float32)),
        grid=grid,
        in_specs=[pl.BlockSpec((t, f_in), lambda i: (i, 0)),
                  pl.BlockSpec((f_in, hf), lambda i: (0, 0)),
                  pl.BlockSpec((hf, 2 * n_heads), lambda i: (0, 0))],
        out_specs=(pl.BlockSpec((t, hf), lambda i: (i, 0)),
                   pl.BlockSpec((t, 2 * n_heads), lambda i: (i, 0))),
        compiler_params=cparams,
    )(x, w_bf16, attn_mat)

    a_src_t = jnp.transpose(alphas[:, :n_heads])             # [H, N] (one transpose per layer)
    a_dst = alphas[:, n_heads:]                              # [N, H]

    # --- masked softmax attention + aggregation, tiled over destination nodes ---
    kernel = functools.partial(_gat_attn_kernel, n_heads=n_heads, f_out=f_out,
                               negative_slope=negative_slope)
    out = pl.pallas_call(
        kernel,
        out_shape=jax.ShapeDtypeStruct((n, hf), jnp.float32),
        grid=grid,
        in_specs=[pl.BlockSpec((t, n_heads), lambda i: (i, 0)),   # alpha_dst tile
                  pl.BlockSpec((n_heads, n), lambda i: (0, 0)),   # alpha_src^T (resident)
                  pl.BlockSpec((n, hf), lambda i: (0, 0)),        # xt (resident, bf16)
                  pl.BlockSpec((t, n), lambda i: (i, 0)),         # int8 mask tile
                  pl.BlockSpec((1, hf), lambda i: (0, 0))],       # bias
        out_specs=pl.BlockSpec((t, hf), lambda i: (i, 0)),
        compiler_params=cparams,
    )(a_dst, a_src_t, xt, mask, bias)
    return out


class GATModule:
    """JAX/Pallas port of the PyTorch GATModule (concat heads, ReLU activation)."""

    def __init__(self, input_size, hidden_sizes, n_heads=2, average_last=False,
                 full_receptive_field=True, add_self_loops=True, key=None):
        assert not average_last  # TODO(synk): head-averaging for the last layer not implemented (config uses concat)
        self.n_heads = n_heads
        self.full_receptive_field = full_receptive_field
        self.add_self_loops = add_self_loops
        sizes = [input_size] + list(hidden_sizes)
        self.out_features = hidden_sizes[-1] * n_heads
        if full_receptive_field:
            self.out_features += sum(h * n_heads for h in hidden_sizes[:-1])

        key = jax.random.PRNGKey(42) if key is None else key
        self.params = []
        for i in range(len(sizes) - 1):
            in_size = sizes[i] if i == 0 else sizes[i] * n_heads
            out_size = sizes[i + 1]
            key, kw, ks, kd = jax.random.split(key, 4)
            scale = (6.0 / (in_size + out_size)) ** 0.5
            w = jax.random.uniform(kw, (in_size, n_heads * out_size), jnp.float32, -scale, scale)
            att_src = jax.random.uniform(ks, (n_heads, out_size), jnp.float32, -scale, scale)
            att_dst = jax.random.uniform(kd, (n_heads, out_size), jnp.float32, -scale, scale)
            # block-diagonal attention matrix A: alphas = xt @ A gives all-head src/dst logits
            attn_mat = jnp.zeros((n_heads * out_size, 2 * n_heads), jnp.float32)
            for h in range(n_heads):
                attn_mat = attn_mat.at[h * out_size:(h + 1) * out_size, h].set(att_src[h])
                attn_mat = attn_mat.at[h * out_size:(h + 1) * out_size, n_heads + h].set(att_dst[h])
            self.params.append(dict(
                w=w, w_bf16=w.astype(jnp.bfloat16),
                att_src=att_src, att_dst=att_dst, attn_mat=attn_mat,
                bias=jnp.zeros((1, n_heads * out_size), jnp.float32),
                f_out=out_size,
            ))

    def _build_mask(self, n, edge_index):
        # dense int8 adjacency mask: mask[dst, src] = 1 (built once per forward, reused per layer)
        mask = jnp.zeros((n, n), jnp.int8)
        mask = mask.at[edge_index[1], edge_index[0]].set(1)
        if self.add_self_loops:
            idx = jnp.arange(n)
            mask = mask.at[idx, idx].set(1)
        return mask

    def __call__(self, x, edge_index):
        n = x.shape[0]
        mask = self._build_mask(n, edge_index)
        # TODO(synk): return_attention_weights / last_layer_attention bookkeeping not reproduced
        # (it does not affect the module output).
        final_x = []
        for i, p in enumerate(self.params):
            x = gat_layer(x, p["w_bf16"], p["attn_mat"], p["bias"], mask,
                          n_heads=self.n_heads, f_out=p["f_out"])
            if self.full_receptive_field or i == len(self.params) - 1:
                final_x.append(x)
        return jnp.concatenate(final_x, axis=1)

    # ------------------------------------------------------------------
    # Pure-JAX fp32 reference (for correctness checking only)
    # ------------------------------------------------------------------
    def reference_forward(self, x, edge_index):
        n = x.shape[0]
        mask = self._build_mask(n, edge_index)
        final_x = []
        for i, p in enumerate(self.params):
            xt = x @ p["w"]
            outs = []
            for h in range(self.n_heads):
                f = p["f_out"]
                xh = xt[:, h * f:(h + 1) * f]
                a_s = (xh * p["att_src"][h]).sum(-1)
                a_d = (xh * p["att_dst"][h]).sum(-1)
                s = a_d[:, None] + a_s[None, :]
                s = jnp.where(s > 0, s, 0.2 * s)
                s = jnp.where(mask > 0, s, -jnp.inf)
                prob = jax.nn.softmax(s, axis=-1)
                outs.append(prob @ xh)
            x = jnp.maximum(jnp.concatenate(outs, axis=-1) + p["bias"], 0.0)
            if self.full_receptive_field or i == len(self.params) - 1:
                final_x.append(x)
        return jnp.concatenate(final_x, axis=1)


if __name__ == "__main__":
    key = jax.random.PRNGKey(0)
    n_nodes, input_size = 8, 8
    hidden_sizes = [16, 8]

    kx, _ = jax.random.split(key)
    x = jax.random.normal(kx, (n_nodes, input_size), jnp.float32)
    # simple directed ring graph plus a few extra edges
    src = jnp.array([0, 1, 2, 3, 4, 5, 6, 7, 0, 3], dtype=jnp.int32)
    dst = jnp.array([1, 2, 3, 4, 5, 6, 7, 0, 4, 7], dtype=jnp.int32)
    edge_index = jnp.stack([src, dst], axis=0)

    module = GATModule(input_size, hidden_sizes, n_heads=2,
                       average_last=False, full_receptive_field=True,
                       key=jax.random.PRNGKey(1))
    out = module(x, edge_index)
    out = jax.block_until_ready(out)

    expected = (n_nodes, module.out_features)  # (8, 48)
    assert out.shape == expected, (out.shape, expected)
    assert bool(jnp.all(jnp.isfinite(out)))

    ref = module.reference_forward(x, edge_index)
    assert bool(jnp.all(jnp.abs(out - ref) <= 0.05 + 0.05 * jnp.abs(ref))), \
        float(jnp.max(jnp.abs(out - ref)))
    print("KERNEL_OK")
</pallas_src>

<mosaic_0001>
module attributes {stable_mosaic.version = 11 : i64} {
  func.func @_gat_project_kernel(%arg0: i32, %arg1: memref<8x8xf32, #tpu.memory_space<vmem>>, %arg2: memref<8x32xbf16, #tpu.memory_space<vmem>>, %arg3: memref<32x4xf32, #tpu.memory_space<vmem>>, %arg4: memref<8x32xbf16, #tpu.memory_space<vmem>>, %arg5: memref<8x4xf32, #tpu.memory_space<vmem>>) attributes {dimension_semantics = [#tpu.dimension_semantics<parallel>], iteration_bounds = array<i64: 1>, scalar_prefetch = 0 : i64, scratch_operands = 0 : i64, tpu.core_type = #tpu.core_type<tc>, window_params = [{transform_indices = @transform_0, window_bounds = array<i64: 8, 8>}, {pipeline_mode = #tpu.pipeline_mode<synchronous>, transform_indices = @transform_1, window_bounds = array<i64: 8, 32>}, {pipeline_mode = #tpu.pipeline_mode<synchronous>, transform_indices = @transform_2, window_bounds = array<i64: 32, 4>}, {transform_indices = @transform_3, window_bounds = array<i64: 8, 32>}, {transform_indices = @transform_4, window_bounds = array<i64: 8, 4>}]} {
    %c0 = arith.constant 0 : index
    %c0_0 = arith.constant 0 : index
    %0 = vector.load %arg1[%c0, %c0_0] : memref<8x8xf32, #tpu.memory_space<vmem>>, vector<8x8xf32>
    %1 = arith.truncf %0 : vector<8x8xf32> to vector<8x8xbf16>
    %c0_1 = arith.constant 0 : index
    %c0_2 = arith.constant 0 : index
    %2 = vector.load %arg2[%c0_1, %c0_2] : memref<8x32xbf16, #tpu.memory_space<vmem>>, vector<8x32xbf16>
    %cst = arith.constant dense<0.000000e+00> : vector<8x32xf32>
    %3 = tpu.matmul %1, %2, %cst {dimension_numbers = #tpu.dot_dimension_numbers<[1], [0], [0], [1], [0, 0, 1, 1], [], []>} : vector<8x8xbf16>, vector<8x32xbf16>, vector<8x32xf32> -> vector<8x32xf32>
    %c0_3 = arith.constant 0 : index
    %c0_4 = arith.constant 0 : index
    %4 = vector.load %arg3[%c0_3, %c0_4] : memref<32x4xf32, #tpu.memory_space<vmem>>, vector<32x4xf32>
    %cst_5 = arith.constant dense<0.000000e+00> : vector<8x4xf32>
    %5 = tpu.matmul %3, %4, %cst_5 {dimension_numbers = #tpu.dot_dimension_numbers<[1], [0], [0], [1], [0, 0, 1, 1], [], []>} : vector<8x32xf32>, vector<32x4xf32>, vector<8x4xf32> -> vector<8x4xf32>
    %c0_6 = arith.constant 0 : index
    %c0_7 = arith.constant 0 : index
    %6 = vector.load %arg5[%c0_6, %c0_7] : memref<8x4xf32, #tpu.memory_space<vmem>>, vector<8x4xf32>
    tpu.vector_store %arg5[%c0_6, %c0_7], %5 {strides = array<i32>} : memref<8x4xf32, #tpu.memory_space<vmem>>, vector<8x4xf32>,
    %7 = arith.truncf %3 : vector<8x32xf32> to vector<8x32xbf16>
    %c0_8 = arith.constant 0 : index
    %c0_9 = arith.constant 0 : index
    %8 = vector.load %arg4[%c0_8, %c0_9] : memref<8x32xbf16, #tpu.memory_space<vmem>>, vector<8x32xbf16>
    tpu.vector_store %arg4[%c0_8, %c0_9], %7 {strides = array<i32>} : memref<8x32xbf16, #tpu.memory_space<vmem>>, vector<8x32xbf16>,
    return
  }
  func.func @transform_0(%arg0: i32) -> (i32, i32) {
    %c0_i32 = arith.constant 0 : i32
    %c0_i32_0 = arith.constant 0 : i32
    return %arg0, %c0_i32 : i32, i32
  }
  func.func @transform_1(%arg0: i32) -> (i32, i32) {
    %c0_i32 = arith.constant 0 : i32
    %c0_i32_0 = arith.constant 0 : i32
    %c0_i32_1 = arith.constant 0 : i32
    return %c0_i32, %c0_i32_0 : i32, i32
  }
  func.func @transform_2(%arg0: i32) -> (i32, i32) {
    %c0_i32 = arith.constant 0 : i32
    %c0_i32_0 = arith.constant 0 : i32
    %c0_i32_1 = arith.constant 0 : i32
    return %c0_i32, %c0_i32_0 : i32, i32
  }
  func.func @transform_3(%arg0: i32) -> (i32, i32) {
    %c0_i32 = arith.constant 0 : i32
    %c0_i32_0 = arith.constant 0 : i32
    return %arg0, %c0_i32 : i32, i32
  }
  func.func @transform_4(%arg0: i32) -> (i32, i32) {
    %c0_i32 = arith.constant 0 : i32
    %c0_i32_0 = arith.constant 0 : i32
    return %arg0, %c0_i32 : i32, i32
  }
}

</mosaic_0001>

<bundles_post_ra>
// kernel: tpu_custom_call.1
= control target key start
LH: loop header
LB: loop body
LE: loop exit
PB: predicated region body
PF: predicated region fallthrough
CT: control target
= control target key end

     0   :  { %vm25_vm0 = vcmask 1043456   ;;  %v230_v2 = vmov 0.0   ;;  %vm231_vm1 = vmmov 0   ;;  %vm21_vm2 = vcmask 64512   ;;  %s292_s0 = inlined_call_operand.vmem [shape: f32[8,8], index: 0, kind: input, shape index: {}]   ;;  %s293_s1 = inlined_call_operand.vmem [shape: bf16[8,32], index: 1, kind: input, shape index: {}]   ;;  %s294_s2 = inlined_call_operand.vmem [shape: f32[32,4], index: 2, kind: input, shape index: {}]   ;;  %s295_s3 = inlined_call_operand.hbm [shape: bf16[8,32], index: 3, kind: output, shape index: {0}]   ;;  %s296_s4 = inlined_call_operand.vmem [shape: f32[8,4], index: 4, kind: output, shape index: {1}]  }
   0x1   :  { %v20_v0 = vld [vmem:[%s293_s1] sm:$0xf]  ;;  %179 = vmatprep.subr.bf16.mxu0 %v230_v2  ;;  %181 = vmatprep.mubr.msk.bf16.mxu0 %vm231_vm1, %v230_v2  ;;  %v70_v6 = vld [vmem:[%s294_s2 + $0x8] sm:$0xff]  ;;  %v71_v7 = vld [vmem:[%s294_s2 + $0x10] sm:$0xff]  ;;  %v232_v8 = vmov 0.0|0.0  }
   0x2   :  { %v18_v1 = vld [vmem:[%s292_s0] sm:$0xff]  ;;  %v27_v3 = vsel %vm25_vm0, %v20_v0, 0  ;;  %196 = vmatprep.subr.bf16.mxu1 %v232_v8  ;;  %v72_v10 = vld [vmem:[%s294_s2 + $0x18] sm:$0xff] }
   0x3   :  { %v19_v4 = vpack.c.bf16 %v18_v1, %v18_v1  ;;  %v69_v5 = vld [vmem:[%s294_s2] sm:$0xff]  ;;  %180 = vmatpush3.bf16.msra.mxu0 %v27_v3 }
   0x4   :  { %v197_v9 = vpack.c.bf16 %v70_v6, %v69_v5 }
   0x5   :  { %10 = vsyncpa [#allocation3], 0  ;;  %193 = vmatprep.mubr.msk.f32.mxu1 %vm231_vm1, %v230_v2  ;;  %v200_v11 = vpack.c.bf16 %v72_v10, %v71_v7  ;;  %vm73_vm3 = vcmask 261120   ;;  %vm150_vm4 = vcmask 257024   ;;  %s233_s25 = smov [#allocation2]  }
   0x6   :  { %198 = vmatpush3.bf16.msra.mxu1 %v197_v9  ;;  %182 = vmatmul.mubr.msk.bf16.vlgmr.msra.gmra.mrb[0].mxu0 %vm21_vm2, %v19_v4  ;;  %s158_s26 = sshll.u32 %s233_s25, 4  ;;  %s159_s26 = int_to_ptr.vmem [resolvable:$true] %s158_s26 }
   0x7   :  { %199 = vmatprep.subr.bf16.mxu1 %v232_v8  ;;  %s206_s2 = scalar_lea.vmem %s159_s26, 64  ;;  %p211_p1 = scmp.lt.s32.totalorder %s159_s26, %s159_s26 }
   0x8   :  { %p207_p0 = scmp.ne.s32.totalorder %s159_s26, %s206_s2  ;;  %p212_p2 = scmp.lt.s32.totalorder %s206_s2, %s206_s2 }
   0xa   :  { %201 = vmatpush3.bf16.msra.mxu1 %v200_v11  ;;  %p213_p3 = por %p212_p2, %p211_p1 }
   0xc   :  { %p214_p4 = pnand %p213_p3, %p207_p0 }
  0xd9   :  { %v63_v12 = vpop.f32.mrb[0].mxu0 }
  0xda   :  { %v149_v13 = vpack.c.bf16 %v63_v12, %v63_v12  ;;  %v183_v14 = vpop.f32.mrb[1].mxu0  ;;  %194 = vmatmul.mubr.msk.f32.vlgmr.msra.gmra.mrb[0].mxu1 %vm73_vm3, %v63_v12 }
  0xdb   :  { %v66_v15 = vpop.f32.mrb[2].mxu0 }
  0xdc   :  { %v184_v16 = vpop.f32.mrb[3].mxu0  ;;  %151 = vst.msk [vmem:[#allocation2] sm:$0xf] %vm150_vm4, %v149_v13 }
  0xdd   :  { %217 = shalt.err (!%p214_p4)
}
  0xde   :  { %s218_s29 = scalar_lea.hbm %s295_s3, 64 }
  0xdf   :  { %p219_p5 = scmp.ne.s32.totalorder %s295_s3, %s218_s29  ;;  %p222_p6 = scmp.lt.u32.totalorder %s218_s29, %s295_s3 }
  0xe1   :  { %p224_p7 = pnand %p222_p6, %p219_p5 }
  0xe3   :  { %227 = shalt.err (!%p224_p7)
}
  0xe4   :  { %161 = dma.vmem_to_hbm [thread:$0]  %s159_s26, 64, %s295_s3, [#allocation3]   ;;  %vm147_vm5 = vcmask 31744  }
 0x1ad   :  { %v143_v17 = vpop.f32.mrb[0].mxu1 }
 0x1ae   :  { %148 = vst.msk [vmem:[%s296_s4] sm:$0xff] %vm147_vm5, %v143_v17  ;;  %v195_v18 = vpop.f32.mrb[1].mxu1 }
 0x1af   :  { %228 = dma.done.wait [#allocation3], 64  }
 0x1b0   :  { %229 = vsyncadd [#allocation3], 4294967232 }
 0x1b1   :  { %169 = vsyncpa [#allocation3], 1 }

</bundles_post_ra>
